<compile_context>
chip_gen: v6e
topology: v6e:2x2x1
jax: 0.10.0
libtpu: 0.0.40
codegen_flags: <defaults>
</compile_context>

<pallas_src>
import math
import functools

import jax
import jax.numpy as jnp
from jax.experimental import pallas as pl
from jax.experimental.pallas import tpu as pltpu


def mhsa_kernel(x_q_ref, x_kv_ref, wq_ref, wkv_ref, wo_ref,
                bq_ref, bkv_ref, bo_ref,
                out_ref, attw_ref,
                k_sc, v_sc,
                *, n_heads, d_head, scale):
    """One grid step = (batch element b, query tile qi).

    x_q_ref  : (1, tq, C)        query rows of this tile
    x_kv_ref : (1, T,  C)        full sequence (only read when qi == 0)
    wq_ref   : (C, C)            pre-transposed  (x @ wq -> q)
    wkv_ref  : (C, 2C)           pre-transposed  (x @ wkv -> [k, v])
    wo_ref   : (H, Dh, C)        head-split Wout.T
    bq_ref   : (1, C)   f32
    bkv_ref  : (1, 2C)  f32
    bo_ref   : (1, C)   f32
    out_ref  : (1, tq, C)
    attw_ref : (1, H, tq, T)
    k_sc/v_sc: (H, T, Dh) VMEM scratch, persistent across the query-tile axis
    """
    H, Dh = n_heads, d_head
    C = H * Dh
    cdt = k_sc.dtype                      # MXU-input dtype (== x.dtype)
    qi = pl.program_id(1)

    # ---- K/V projection, once per batch element, stored head-major ----------
    @pl.when(qi == 0)
    def _():
        xf = x_kv_ref[0]                                               # (T, C)
        kv = jnp.dot(xf, wkv_ref[...],
                     preferred_element_type=jnp.float32) + bkv_ref[0]  # (T, 2C)
        # Head-split relayout (static, small H): lane slices + leading-axis stack.
        k_sc[...] = jnp.stack(
            [kv[:, h * Dh:(h + 1) * Dh] for h in range(H)], axis=0).astype(cdt)
        v_sc[...] = jnp.stack(
            [kv[:, C + h * Dh:C + (h + 1) * Dh] for h in range(H)], axis=0).astype(cdt)

    # ---- Q projection for this query tile (lane-dense (tq,C)x(C,C) matmul) --
    xq = x_q_ref[0]                                                    # (tq, C)
    q_flat = jnp.dot(xq, wq_ref[...],
                     preferred_element_type=jnp.float32) + bq_ref[0]   # (tq, C)
    q = jnp.stack([q_flat[:, h * Dh:(h + 1) * Dh] for h in range(H)],
                  axis=0).astype(cdt)                                  # (H, tq, Dh)

    # ---- head-batched attention: no per-head k.T, no output concat ----------
    s = jnp.einsum('hqd,hkd->hqk', q, k_sc[...],
                   preferred_element_type=jnp.float32) * scale         # (H, tq, T)
    s = s - jnp.max(s, axis=-1, keepdims=True)                         # stable
    p = jnp.exp(s)                                                     # f32 softmax
    denom = jnp.sum(p, axis=-1, keepdims=True)
    p = p * pl.reciprocal(denom, approx=True)                          # EUP recip

    attw_ref[0] = p.astype(attw_ref.dtype)                             # (H, tq, T)

    ao = jnp.einsum('hqk,hkd->hqd', p.astype(cdt), v_sc[...],
                    preferred_element_type=jnp.float32)                # (H, tq, Dh)

    # ---- output projection:  sum_h ao_h @ Wout_h  ==  concat(heads) @ Wout.T
    out_h = jnp.einsum('hqd,hdc->hqc', ao.astype(cdt), wo_ref[...],
                       preferred_element_type=jnp.float32)             # (H, tq, C)
    out = jnp.sum(out_h, axis=0) + bo_ref[0]                           # (tq, C)
    out_ref[0] = out.astype(out_ref.dtype)


def multi_head_self_attention(x, wqkv, bqkv, wout, bout, n_heads):
    B, T, C = x.shape
    assert C % n_heads == 0
    H = n_heads
    Dh = C // H

    # Query tile: biggest of {512, 256, 128} that divides T while keeping the
    # (1, H, tq, T) attention-weights block modest (<= ~8 MiB before double
    # buffering); otherwise a single tile (small T, as in the test below).
    itemsize = jnp.dtype(x.dtype).itemsize
    tq = T
    for cand in (512, 256, 128):
        if T % cand == 0 and H * cand * T * itemsize <= 8 * 1024 * 1024:
            tq = cand
            break
    nq = T // tq

    f32 = jnp.float32
    # PyTorch layout: wqkv rows [q(C); k(C); v(C)], each (out=C, in=C).
    wq_t = wqkv[:C].T.astype(x.dtype)                     # (C, C)
    wkv_t = wqkv[C:].T.astype(x.dtype)                    # (C, 2C)
    wo_h = wout.T.reshape(H, Dh, C).astype(x.dtype)       # head-split Wout.T
    bq = bqkv[:C].astype(f32).reshape(1, C)
    bkv = bqkv[C:].astype(f32).reshape(1, 2 * C)
    bo = bout.astype(f32).reshape(1, C)

    kern = functools.partial(mhsa_kernel, n_heads=H, d_head=Dh,
                             scale=1.0 / math.sqrt(Dh))

    grid_spec = pltpu.PrefetchScalarGridSpec(
        num_scalar_prefetch=0,
        grid=(B, nq),
        in_specs=[
            pl.BlockSpec((1, tq, C), lambda b, qi: (b, qi, 0)),   # query rows
            pl.BlockSpec((1, T, C), lambda b, qi: (b, 0, 0)),     # full seq (K/V)
            pl.BlockSpec((C, C), lambda b, qi: (0, 0)),           # wq_t
            pl.BlockSpec((C, 2 * C), lambda b, qi: (0, 0)),       # wkv_t
            pl.BlockSpec((H, Dh, C), lambda b, qi: (0, 0, 0)),    # wo_h
            pl.BlockSpec((1, C), lambda b, qi: (0, 0)),           # bq
            pl.BlockSpec((1, 2 * C), lambda b, qi: (0, 0)),       # bkv
            pl.BlockSpec((1, C), lambda b, qi: (0, 0)),           # bo
        ],
        out_specs=(
            pl.BlockSpec((1, tq, C), lambda b, qi: (b, qi, 0)),
            pl.BlockSpec((1, H, tq, T), lambda b, qi: (b, 0, qi, 0)),
        ),
        scratch_shapes=[
            pltpu.VMEM((H, T, Dh), x.dtype),   # K, head-major, per batch elem
            pltpu.VMEM((H, T, Dh), x.dtype),   # V
        ],
    )

    out, attw = pl.pallas_call(
        kern,
        out_shape=(
            jax.ShapeDtypeStruct((B, T, C), x.dtype),
            jax.ShapeDtypeStruct((B, H, T, T), x.dtype),
        ),
        grid_spec=grid_spec,
        compiler_params=pltpu.CompilerParams(
            dimension_semantics=("parallel", "arbitrary"),  # megacore over batch
            vmem_limit_bytes=48 * 1024 * 1024,              # safe on 64 MiB v7x
        ),
    )(x, x, wq_t, wkv_t, wo_h, bq, bkv, bo)
    return out, attw


def reference_mhsa(x, wqkv, bqkv, wout, bout, n_heads):
    """Plain-JAX mirror of the PyTorch forward, for validation."""
    B, T, C = x.shape
    d_head = C // n_heads
    qkv = x @ wqkv.T + bqkv                             # (B, T, 3C)
    qkv = qkv.reshape(B, T, 3, n_heads, d_head)
    q, k, v = qkv[:, :, 0], qkv[:, :, 1], qkv[:, :, 2]  # (B, T, H, Dh)
    q = jnp.transpose(q, (0, 2, 1, 3))                  # (B, H, T, Dh)
    k = jnp.transpose(k, (0, 2, 1, 3))
    v = jnp.transpose(v, (0, 2, 1, 3))
    scores = (q @ jnp.swapaxes(k, -2, -1)) / math.sqrt(d_head)
    attw = jax.nn.softmax(scores, axis=-1)              # (B, H, T, T)
    a = attw @ v                                        # (B, H, T, Dh)
    a = jnp.transpose(a, (0, 2, 1, 3)).reshape(B, T, C)
    return a @ wout.T + bout, attw


if __name__ == "__main__":
    B, T, d_model, n_heads = 2, 8, 32, 4

    key = jax.random.PRNGKey(0)
    kx, k1, k2, k3, k4 = jax.random.split(key, 5)

    bound = 1.0 / math.sqrt(d_model)
    x = jax.random.normal(kx, (B, T, d_model), dtype=jnp.float32)
    wqkv = jax.random.uniform(k1, (3 * d_model, d_model),
                              minval=-bound, maxval=bound, dtype=jnp.float32)
    bqkv = jax.random.uniform(k2, (3 * d_model,),
                              minval=-bound, maxval=bound, dtype=jnp.float32)
    wout = jax.random.uniform(k3, (d_model, d_model),
                              minval=-bound, maxval=bound, dtype=jnp.float32)
    bout = jax.random.uniform(k4, (d_model,),
                              minval=-bound, maxval=bound, dtype=jnp.float32)

    out, attw = multi_head_self_attention(x, wqkv, bqkv, wout, bout, n_heads)
    out = jax.block_until_ready(out)
    attw = jax.block_until_ready(attw)

    ref_out, ref_attw = reference_mhsa(x, wqkv, bqkv, wout, bout, n_heads)
    assert out.shape == (B, T, d_model)
    assert attw.shape == (B, n_heads, T, T)
    # Tolerance slightly loosened vs. exact-division softmax because the
    # kernel uses the EUP approximate reciprocal for the softmax normalizer.
    assert jnp.allclose(out, ref_out, atol=2e-3, rtol=2e-3)
    assert jnp.allclose(attw, ref_attw, atol=2e-3, rtol=2e-3)

    print("KERNEL_OK")
</pallas_src>

<mosaic_0001>
module attributes {stable_mosaic.version = 11 : i64} {
  func.func @mhsa_kernel(%arg0: i32, %arg1: i32, %arg2: memref<1x8x32xf32, #tpu.memory_space<vmem>>, %arg3: memref<1x8x32xf32, #tpu.memory_space<vmem>>, %arg4: memref<32x32xf32, #tpu.memory_space<vmem>>, %arg5: memref<32x64xf32, #tpu.memory_space<vmem>>, %arg6: memref<4x8x32xf32, #tpu.memory_space<vmem>>, %arg7: memref<1x32xf32, #tpu.memory_space<vmem>>, %arg8: memref<1x64xf32, #tpu.memory_space<vmem>>, %arg9: memref<1x32xf32, #tpu.memory_space<vmem>>, %arg10: memref<1x8x32xf32, #tpu.memory_space<vmem>>, %arg11: memref<1x4x8x8xf32, #tpu.memory_space<vmem>>, %arg12: memref<4x8x8xf32, #tpu.memory_space<vmem>>, %arg13: memref<4x8x8xf32, #tpu.memory_space<vmem>>) attributes {dimension_semantics = [#tpu.dimension_semantics<parallel>, #tpu.dimension_semantics<arbitrary>], iteration_bounds = array<i64: 2, 1>, scalar_prefetch = 0 : i64, scratch_operands = 2 : i64, tpu.core_type = #tpu.core_type<tc>, window_params = [{transform_indices = @transform_0, window_bounds = array<i64: 1, 8, 32>}, {transform_indices = @transform_1, window_bounds = array<i64: 1, 8, 32>}, {pipeline_mode = #tpu.pipeline_mode<synchronous>, transform_indices = @transform_2, window_bounds = array<i64: 32, 32>}, {pipeline_mode = #tpu.pipeline_mode<synchronous>, transform_indices = @transform_3, window_bounds = array<i64: 32, 64>}, {pipeline_mode = #tpu.pipeline_mode<synchronous>, transform_indices = @transform_4, window_bounds = array<i64: 4, 8, 32>}, {pipeline_mode = #tpu.pipeline_mode<synchronous>, transform_indices = @transform_5, window_bounds = array<i64: 1, 32>}, {pipeline_mode = #tpu.pipeline_mode<synchronous>, transform_indices = @transform_6, window_bounds = array<i64: 1, 64>}, {pipeline_mode = #tpu.pipeline_mode<synchronous>, transform_indices = @transform_7, window_bounds = array<i64: 1, 32>}, {transform_indices = @transform_8, window_bounds = array<i64: 1, 8, 32>}, {transform_indices = @transform_9, window_bounds = array<i64: 1, 4, 8, 8>}]} {
    %c0_i32 = arith.constant 0 : i32
    %0 = arith.cmpi eq, %arg1, %c0_i32 : i32
    %1 = arith.extui %0 : i1 to i32
    %c0_i32_0 = arith.constant 0 : i32
    %2 = arith.cmpi ne, %1, %c0_i32_0 : i32
    scf.if %2 {
      %c0_32 = arith.constant 0 : index
      %c0_33 = arith.constant 0 : index
      %c0_34 = arith.constant 0 : index
      %51 = vector.load %arg3[%c0_32, %c0_33, %c0_34] : memref<1x8x32xf32, #tpu.memory_space<vmem>>, vector<1x8x32xf32>
      %52 = vector.shape_cast %51 : vector<1x8x32xf32> to vector<8x32xf32>
      %c0_35 = arith.constant 0 : index
      %c0_36 = arith.constant 0 : index
      %53 = vector.load %arg5[%c0_35, %c0_36] : memref<32x64xf32, #tpu.memory_space<vmem>>, vector<32x64xf32>
      %cst_37 = arith.constant dense<0.000000e+00> : vector<8x64xf32>
      %54 = tpu.matmul %52, %53, %cst_37 {dimension_numbers = #tpu.dot_dimension_numbers<[1], [0], [0], [1], [0, 0, 1, 1], [], []>} : vector<8x32xf32>, vector<32x64xf32>, vector<8x64xf32> -> vector<8x64xf32>
      %c0_38 = arith.constant 0 : index
      %c0_39 = arith.constant 0 : index
      %55 = vector.load %arg8[%c0_38, %c0_39] : memref<1x64xf32, #tpu.memory_space<vmem>>, vector<1x64xf32>
      %56 = vector.shape_cast %55 : vector<1x64xf32> to vector<64xf32>
      %57 = vector.shape_cast %56 : vector<64xf32> to vector<1x64xf32>
      %58 = vector.broadcast %57 : vector<1x64xf32> to vector<8x64xf32>
      %59 = arith.addf %54, %58 : vector<8x64xf32>
      %60 = vector.extract_strided_slice %59 {offsets = [0, 0], sizes = [8, 8], strides = [1, 1]} : vector<8x64xf32> to vector<8x8xf32>
      %61 = vector.extract_strided_slice %59 {offsets = [0, 8], sizes = [8, 8], strides = [1, 1]} : vector<8x64xf32> to vector<8x8xf32>
      %62 = vector.extract_strided_slice %59 {offsets = [0, 16], sizes = [8, 8], strides = [1, 1]} : vector<8x64xf32> to vector<8x8xf32>
      %63 = vector.extract_strided_slice %59 {offsets = [0, 24], sizes = [8, 8], strides = [1, 1]} : vector<8x64xf32> to vector<8x8xf32>
      %64 = vector.shape_cast %60 : vector<8x8xf32> to vector<1x8x8xf32>
      %65 = vector.shape_cast %61 : vector<8x8xf32> to vector<1x8x8xf32>
      %66 = vector.shape_cast %62 : vector<8x8xf32> to vector<1x8x8xf32>
      %67 = vector.shape_cast %63 : vector<8x8xf32> to vector<1x8x8xf32>
      %68 = tpu.concatenate %64, %65, %66, %67 in 0 : vector<1x8x8xf32>, vector<1x8x8xf32>, vector<1x8x8xf32>, vector<1x8x8xf32> -> vector<4x8x8xf32>
      %c0_40 = arith.constant 0 : index
      %c0_41 = arith.constant 0 : index
      %c0_42 = arith.constant 0 : index
      %69 = vector.load %arg12[%c0_40, %c0_41, %c0_42] : memref<4x8x8xf32, #tpu.memory_space<vmem>>, vector<4x8x8xf32>
      tpu.vector_store %arg12[%c0_40, %c0_41, %c0_42], %68 {strides = array<i32>} : memref<4x8x8xf32, #tpu.memory_space<vmem>>, vector<4x8x8xf32>,
      %70 = vector.extract_strided_slice %59 {offsets = [0, 32], sizes = [8, 8], strides = [1, 1]} : vector<8x64xf32> to vector<8x8xf32>
      %71 = vector.extract_strided_slice %59 {offsets = [0, 40], sizes = [8, 8], strides = [1, 1]} : vector<8x64xf32> to vector<8x8xf32>
      %72 = vector.extract_strided_slice %59 {offsets = [0, 48], sizes = [8, 8], strides = [1, 1]} : vector<8x64xf32> to vector<8x8xf32>
      %73 = vector.extract_strided_slice %59 {offsets = [0, 56], sizes = [8, 8], strides = [1, 1]} : vector<8x64xf32> to vector<8x8xf32>
      %74 = vector.shape_cast %70 : vector<8x8xf32> to vector<1x8x8xf32>
      %75 = vector.shape_cast %71 : vector<8x8xf32> to vector<1x8x8xf32>
      %76 = vector.shape_cast %72 : vector<8x8xf32> to vector<1x8x8xf32>
      %77 = vector.shape_cast %73 : vector<8x8xf32> to vector<1x8x8xf32>
      %78 = tpu.concatenate %74, %75, %76, %77 in 0 : vector<1x8x8xf32>, vector<1x8x8xf32>, vector<1x8x8xf32>, vector<1x8x8xf32> -> vector<4x8x8xf32>
      %c0_43 = arith.constant 0 : index
      %c0_44 = arith.constant 0 : index
      %c0_45 = arith.constant 0 : index
      %79 = vector.load %arg13[%c0_43, %c0_44, %c0_45] : memref<4x8x8xf32, #tpu.memory_space<vmem>>, vector<4x8x8xf32>
      tpu.vector_store %arg13[%c0_43, %c0_44, %c0_45], %78 {strides = array<i32>} : memref<4x8x8xf32, #tpu.memory_space<vmem>>, vector<4x8x8xf32>,
    } else {
    }
    %c0 = arith.constant 0 : index
    %c0_1 = arith.constant 0 : index
    %c0_2 = arith.constant 0 : index
    %3 = vector.load %arg2[%c0, %c0_1, %c0_2] : memref<1x8x32xf32, #tpu.memory_space<vmem>>, vector<1x8x32xf32>
    %4 = vector.shape_cast %3 : vector<1x8x32xf32> to vector<8x32xf32>
    %c0_3 = arith.constant 0 : index
    %c0_4 = arith.constant 0 : index
    %5 = vector.load %arg4[%c0_3, %c0_4] : memref<32x32xf32, #tpu.memory_space<vmem>>, vector<32x32xf32>
    %cst = arith.constant dense<0.000000e+00> : vector<8x32xf32>
    %6 = tpu.matmul %4, %5, %cst {dimension_numbers = #tpu.dot_dimension_numbers<[1], [0], [0], [1], [0, 0, 1, 1], [], []>} : vector<8x32xf32>, vector<32x32xf32>, vector<8x32xf32> -> vector<8x32xf32>
    %c0_5 = arith.constant 0 : index
    %c0_6 = arith.constant 0 : index
    %7 = vector.load %arg7[%c0_5, %c0_6] : memref<1x32xf32, #tpu.memory_space<vmem>>, vector<1x32xf32>
    %8 = vector.shape_cast %7 : vector<1x32xf32> to vector<32xf32>
    %9 = vector.shape_cast %8 : vector<32xf32> to vector<1x32xf32>
    %10 = vector.broadcast %9 : vector<1x32xf32> to vector<8x32xf32>
    %11 = arith.addf %6, %10 : vector<8x32xf32>
    %12 = vector.extract_strided_slice %11 {offsets = [0, 0], sizes = [8, 8], strides = [1, 1]} : vector<8x32xf32> to vector<8x8xf32>
    %13 = vector.extract_strided_slice %11 {offsets = [0, 8], sizes = [8, 8], strides = [1, 1]} : vector<8x32xf32> to vector<8x8xf32>
    %14 = vector.extract_strided_slice %11 {offsets = [0, 16], sizes = [8, 8], strides = [1, 1]} : vector<8x32xf32> to vector<8x8xf32>
    %15 = vector.extract_strided_slice %11 {offsets = [0, 24], sizes = [8, 8], strides = [1, 1]} : vector<8x32xf32> to vector<8x8xf32>
    %16 = vector.shape_cast %12 : vector<8x8xf32> to vector<1x8x8xf32>
    %17 = vector.shape_cast %13 : vector<8x8xf32> to vector<1x8x8xf32>
    %18 = vector.shape_cast %14 : vector<8x8xf32> to vector<1x8x8xf32>
    %19 = vector.shape_cast %15 : vector<8x8xf32> to vector<1x8x8xf32>
    %20 = tpu.concatenate %16, %17, %18, %19 in 0 : vector<1x8x8xf32>, vector<1x8x8xf32>, vector<1x8x8xf32>, vector<1x8x8xf32> -> vector<4x8x8xf32>
    %c0_7 = arith.constant 0 : index
    %c0_8 = arith.constant 0 : index
    %c0_9 = arith.constant 0 : index
    %21 = vector.load %arg12[%c0_7, %c0_8, %c0_9] : memref<4x8x8xf32, #tpu.memory_space<vmem>>, vector<4x8x8xf32>
    "tpu.trace_start"() <{level = 10 : i32, message = "hqd,hkd->hqk"}> : () -> ()
    %cst_10 = arith.constant dense<0.000000e+00> : vector<4x8x8xf32>
    %22 = tpu.matmul %20, %21, %cst_10 {dimension_numbers = #tpu.dot_dimension_numbers<[2], [2], [1], [1], [0, 0, 0, 1, 1, 1], [0], [0]>} : vector<4x8x8xf32>, vector<4x8x8xf32>, vector<4x8x8xf32> -> vector<4x8x8xf32>
    "tpu.trace_stop"() : () -> ()
    %cst_11 = arith.constant 0.353553385 : f32
    %23 = vector.broadcast %cst_11 : f32 to vector<4x8x8xf32>
    %24 = arith.mulf %22, %23 : vector<4x8x8xf32>
    %cst_12 = arith.constant dense<0xFF800000> : vector<4x8xf32>
    %25 = vector.multi_reduction <maximumf>, %24, %cst_12 [2] : vector<4x8x8xf32> to vector<4x8xf32>
    %26 = vector.shape_cast %25 : vector<4x8xf32> to vector<4x8x1xf32>
    %27 = vector.broadcast %26 : vector<4x8x1xf32> to vector<4x8x8xf32>
    %28 = arith.subf %24, %27 : vector<4x8x8xf32>
    %29 = math.exp %28 : vector<4x8x8xf32>
    %cst_13 = arith.constant dense<0.000000e+00> : vector<4x8xf32>
    %30 = vector.multi_reduction <add>, %29, %cst_13 [2] : vector<4x8x8xf32> to vector<4x8xf32>
    %31 = vector.shape_cast %30 : vector<4x8xf32> to vector<4x8x1xf32>
    %32 = tpu.reciprocal %31 {approx = true} : vector<4x8x1xf32> -> vector<4x8x1xf32>
    %33 = vector.broadcast %32 : vector<4x8x1xf32> to vector<4x8x8xf32>
    %34 = arith.mulf %29, %33 : vector<4x8x8xf32>
    %c0_14 = arith.constant 0 : index
    %c0_15 = arith.constant 0 : index
    %c0_16 = arith.constant 0 : index
    %c0_17 = arith.constant 0 : index
    %35 = vector.load %arg11[%c0_14, %c0_15, %c0_16, %c0_17] : memref<1x4x8x8xf32, #tpu.memory_space<vmem>>, vector<1x4x8x8xf32>
    %36 = vector.shape_cast %35 : vector<1x4x8x8xf32> to vector<4x8x8xf32>
    %37 = vector.shape_cast %34 : vector<4x8x8xf32> to vector<1x4x8x8xf32>
    tpu.vector_store %arg11[%c0_14, %c0_15, %c0_16, %c0_17], %37 {strides = array<i32>} : memref<1x4x8x8xf32, #tpu.memory_space<vmem>>, vector<1x4x8x8xf32>,
    %c0_18 = arith.constant 0 : index
    %c0_19 = arith.constant 0 : index
    %c0_20 = arith.constant 0 : index
    %38 = vector.load %arg13[%c0_18, %c0_19, %c0_20] : memref<4x8x8xf32, #tpu.memory_space<vmem>>, vector<4x8x8xf32>
    "tpu.trace_start"() <{level = 10 : i32, message = "hqk,hkd->hqd"}> : () -> ()
    %cst_21 = arith.constant dense<0.000000e+00> : vector<4x8x8xf32>
    %39 = tpu.matmul %34, %38, %cst_21 {dimension_numbers = #tpu.dot_dimension_numbers<[2], [1], [1], [2], [0, 0, 0, 1, 1, 2], [0], [0]>} : vector<4x8x8xf32>, vector<4x8x8xf32>, vector<4x8x8xf32> -> vector<4x8x8xf32>
    "tpu.trace_stop"() : () -> ()
    %c0_22 = arith.constant 0 : index
    %c0_23 = arith.constant 0 : index
    %c0_24 = arith.constant 0 : index
    %40 = vector.load %arg6[%c0_22, %c0_23, %c0_24] : memref<4x8x32xf32, #tpu.memory_space<vmem>>, vector<4x8x32xf32>
    "tpu.trace_start"() <{level = 10 : i32, message = "hqd,hdc->hqc"}> : () -> ()
    %cst_25 = arith.constant dense<0.000000e+00> : vector<4x8x32xf32>
    %41 = tpu.matmul %39, %40, %cst_25 {dimension_numbers = #tpu.dot_dimension_numbers<[2], [1], [1], [2], [0, 0, 0, 1, 1, 2], [0], [0]>} : vector<4x8x8xf32>, vector<4x8x32xf32>, vector<4x8x32xf32> -> vector<4x8x32xf32>
    "tpu.trace_stop"() : () -> ()
    %cst_26 = arith.constant dense<0.000000e+00> : vector<8x32xf32>
    %42 = vector.multi_reduction <add>, %41, %cst_26 [0] : vector<4x8x32xf32> to vector<8x32xf32>
    %c0_27 = arith.constant 0 : index
    %c0_28 = arith.constant 0 : index
    %43 = vector.load %arg9[%c0_27, %c0_28] : memref<1x32xf32, #tpu.memory_space<vmem>>, vector<1x32xf32>
    %44 = vector.shape_cast %43 : vector<1x32xf32> to vector<32xf32>
    %45 = vector.shape_cast %44 : vector<32xf32> to vector<1x32xf32>
    %46 = vector.broadcast %45 : vector<1x32xf32> to vector<8x32xf32>
    %47 = arith.addf %42, %46 : vector<8x32xf32>
    %c0_29 = arith.constant 0 : index
    %c0_30 = arith.constant 0 : index
    %c0_31 = arith.constant 0 : index
    %48 = vector.load %arg10[%c0_29, %c0_30, %c0_31] : memref<1x8x32xf32, #tpu.memory_space<vmem>>, vector<1x8x32xf32>
    %49 = vector.shape_cast %48 : vector<1x8x32xf32> to vector<8x32xf32>
    %50 = vector.shape_cast %47 : vector<8x32xf32> to vector<1x8x32xf32>
    tpu.vector_store %arg10[%c0_29, %c0_30, %c0_31], %50 {strides = array<i32>} : memref<1x8x32xf32, #tpu.memory_space<vmem>>, vector<1x8x32xf32>,
    return
  }
  func.func @transform_0(%arg0: i32, %arg1: i32) -> (i32, i32, i32) {
    %c0_i32 = arith.constant 0 : i32
    %c0_i32_0 = arith.constant 0 : i32
    return %arg0, %arg1, %c0_i32 : i32, i32, i32
  }
  func.func @transform_1(%arg0: i32, %arg1: i32) -> (i32, i32, i32) {
    %c0_i32 = arith.constant 0 : i32
    %c0_i32_0 = arith.constant 0 : i32
    %c0_i32_1 = arith.constant 0 : i32
    return %arg0, %c0_i32, %c0_i32_0 : i32, i32, i32
  }
  func.func @transform_2(%arg0: i32, %arg1: i32) -> (i32, i32) {
    %c0_i32 = arith.constant 0 : i32
    %c0_i32_0 = arith.constant 0 : i32
    %c0_i32_1 = arith.constant 0 : i32
    return %c0_i32, %c0_i32_0 : i32, i32
  }
  func.func @transform_3(%arg0: i32, %arg1: i32) -> (i32, i32) {
    %c0_i32 = arith.constant 0 : i32
    %c0_i32_0 = arith.constant 0 : i32
    %c0_i32_1 = arith.constant 0 : i32
    return %c0_i32, %c0_i32_0 : i32, i32
  }
  func.func @transform_4(%arg0: i32, %arg1: i32) -> (i32, i32, i32) {
    %c0_i32 = arith.constant 0 : i32
    %c0_i32_0 = arith.constant 0 : i32
    %c0_i32_1 = arith.constant 0 : i32
    %c0_i32_2 = arith.constant 0 : i32
    return %c0_i32, %c0_i32_0, %c0_i32_1 : i32, i32, i32
  }
  func.func @transform_5(%arg0: i32, %arg1: i32) -> (i32, i32) {
    %c0_i32 = arith.constant 0 : i32
    %c0_i32_0 = arith.constant 0 : i32
    %c0_i32_1 = arith.constant 0 : i32
    return %c0_i32, %c0_i32_0 : i32, i32
  }
  func.func @transform_6(%arg0: i32, %arg1: i32) -> (i32, i32) {
    %c0_i32 = arith.constant 0 : i32
    %c0_i32_0 = arith.constant 0 : i32
    %c0_i32_1 = arith.constant 0 : i32
    return %c0_i32, %c0_i32_0 : i32, i32
  }
  func.func @transform_7(%arg0: i32, %arg1: i32) -> (i32, i32) {
    %c0_i32 = arith.constant 0 : i32
    %c0_i32_0 = arith.constant 0 : i32
    %c0_i32_1 = arith.constant 0 : i32
    return %c0_i32, %c0_i32_0 : i32, i32
  }
  func.func @transform_8(%arg0: i32, %arg1: i32) -> (i32, i32, i32) {
    %c0_i32 = arith.constant 0 : i32
    %c0_i32_0 = arith.constant 0 : i32
    return %arg0, %arg1, %c0_i32 : i32, i32, i32
  }
  func.func @transform_9(%arg0: i32, %arg1: i32) -> (i32, i32, i32, i32) {
    %c0_i32 = arith.constant 0 : i32
    %c0_i32_0 = arith.constant 0 : i32
    %c0_i32_1 = arith.constant 0 : i32
    return %arg0, %c0_i32, %arg1, %c0_i32_0 : i32, i32, i32, i32
  }
}

</mosaic_0001>

<bundles_post_ra>
// kernel: tpu_custom_call.1
= control target key start
LH: loop header
LB: loop body
LE: loop exit
PB: predicated region body
PF: predicated region fallthrough
CT: control target
= control target key end

     0   :  { %s2828_s0 = inlined_call_operand.hbm [shape: f32[2,8,32], index: 0, kind: input, shape index: {}]   ;;  %s2829_s1 = inlined_call_operand.hbm [shape: f32[2,8,32], index: 1, kind: input, shape index: {}]   ;;  %s2830_s2 = inlined_call_operand.hbm [shape: f32[32,32], index: 2, kind: input, shape index: {}]   ;;  %s2831_s3 = inlined_call_operand.hbm [shape: f32[32,64], index: 3, kind: input, shape index: {}]   ;;  %s2832_s4 = inlined_call_operand.hbm [shape: f32[4,8,32], index: 4, kind: input, shape index: {}]   ;;  %s2833_s5 = inlined_call_operand.vmem [shape: f32[1,32], index: 5, kind: input, shape index: {}]   ;;  %s2834_s6 = inlined_call_operand.vmem [shape: f32[1,64], index: 6, kind: input, shape index: {}]   ;;  %s2835_s7 = inlined_call_operand.vmem [shape: f32[1,32], index: 7, kind: input, shape index: {}]   ;;  %s2836_s8 = inlined_call_operand.hbm [shape: f32[2,8,32], index: 8, kind: output, shape index: {0}]   ;;  %s2837_s9 = inlined_call_operand.hbm [shape: f32[2,4,8,8], index: 9, kind: output, shape index: {1}]  }
   0x1   :  { %2843 = sst [smem:[#allocation25_spill]] %s2828_s0 }
   0x2   :  { %2844 = sst [smem:[#allocation26_spill]] %s2830_s2 }
   0x3   :  { %2845 = sst [smem:[#allocation27_spill]] %s2831_s3 }
   0x4   :  { %2846 = sst [smem:[#allocation28_spill]] %s2832_s4 }
   0x5   :  { %15 = vsyncpa [#allocation5], 0 }
   0x6   :  { %17 = vsyncpa [#allocation5 + $0x1], 0 }
   0x7   :  { %18 = vsyncpa [#allocation8], 0 }
   0x8   :  { %20 = vsyncpa [#allocation8 + $0x1], 0 }
   0x9   :  { %21 = vsyncpa [#allocation11], 0 }
   0xa   :  { %22 = vsyncpa [#allocation6], 0 }
   0xb   :  { %24 = vsyncpa [#allocation6 + $0x1], 0 }
   0xc   :  { %25 = vsyncpa [#allocation15], 0 }
   0xd   :  { %27 = vsyncpa [#allocation15 + $0x1], 0  ;;  %s2457_s30 = smov 0   ;;  %s2459_s10 = smov 0  }
   0xe   :  { %s2461_s11 = smov 0   ;;  %s2463_s12 = smov 0  }
   0xf   :  { %s2465_s13 = smov 0   ;;  %s2467_s14 = smov 0  }
  0x10 LB: > { %2847 = sst [smem:[#allocation22_spill]] %s2368_s30  ;;  %s2488_s15 = sadd.s32 4294967295, %s2388_s14   ;;  %s2388_s14 = sphi %s2467_s14, %s33_s14   ;;  %s2384_s13 = sphi %s2465_s13, %s2875_s13   ;;  %s2380_s12 = sphi %s2463_s12, %s2874_s12   ;;  %s2376_s11 = sphi %s2461_s11, %s2873_s11   ;;  %s2372_s10 = sphi %s2459_s10, %s2872_s10   ;;  %s2368_s30 = sphi %s2457_s30, %s2871_s30  }
  0x11   : > { %s1840_s16 = sadd.s32 4294967294, %s2388_s14   ;;  %p67_p0 = scmp.ne.s32.totalorder %s2372_s10, %s2368_s30 }
  0x12   : > { %p2838_p1 = scmp.eq.s32.totalorder %s2488_s15, 0  ;;  %p251_p3 = scmp.eq.s32.totalorder %s1840_s16, 1 }
  0x13   : > { %p1841_p5 = scmp.ge.s32.totalorder %s2388_s14, 1  ;;  %p286_p7 = scmp.lt.s32.totalorder %s2388_s14, 3 }
  0x14   : > { %p2497_p4 = por %p2838_p1, %p67_p0  ;;  %p2502_p6 = por %p251_p3, %p67_p0 }
  0x15   : > { %p2507_p8 = pnand %p1841_p5, %p286_p7  ;;  %s2390_s20 = smov [#allocation9]  }
  0x16   : > { %s2848_s17 = scalar_select %p2497_p4, 1, 0 }
  0x17   : > { %s2849_s18 = scalar_select %p2502_p6, 1, 0 }
  0x18   : > { %s298_s21 = sshll.u32 %s2390_s20, 4  ;;  %p2023_p9 = pneg %p2507_p8  ;;  %s299_s21 = int_to_ptr.vmem [resolvable:$true] %s298_s21 }
  0x19   : > { %2850 = sst [smem:[#allocation23_spill]] %s2849_s18  ;;  %s2391_s23 = smov [#allocation10]  }
  0x1a   : > { %p2516_p11 = pnand %p2023_p9, %p2838_p1  ;;  %s311_s24 = sshll.u32 %s2391_s23, 4  ;;  %s312_s24 = int_to_ptr.vmem [resolvable:$true] %s311_s24 }
  0x1b   : > { %s2392_s25 = smov [#allocation12]   ;;  %s2143_s27 = scalar_lea.vmem %s299_s21, 512 }
  0x1c   : > { %s324_s26 = sshll.u32 %s2392_s25, 4  ;;  %p2134_p12 = pneg %p2516_p11  ;;  %s325_s26 = int_to_ptr.vmem [resolvable:$true] %s324_s26 }
  0x1d   : > { %p2144_p13 = scmp.ne.s32.totalorder %s299_s21, %s2143_s27  ;;  %p2151_p5 = scmp.lt.s32.totalorder %s299_s21, %s299_s21 }
  0x1e   : > { %p2152_p7 = scmp.lt.s32.totalorder %s2143_s27, %s2143_s27 }
  0x1f   : > { %p2146_p0 = pnand %p2144_p13, %p2134_p12 }
  0x20   : > { %p2153_p9 = por %p2152_p7, %p2151_p5 }
  0x21   : > { %p2147_p3 = pneg %p2146_p0 }
  0x23   : > { %p2154_p10 = pnand %p2153_p9, %p2147_p3 }
  0x25   : > { %2157 = shalt.err (!%p2154_p10)
}
  0x26   : > { %s2393_s28 = smov 128   ;;  %s2394_s29 = smov 8  }
  0x27   : > { %s2853_s2 = sld [smem:[#allocation26_spill]]  ;;  %s2169_s23 = scalar_lea.vmem %s312_s24, 512 }
  0x28   : > { %p2170_p1 = scmp.ne.s32.totalorder %s312_s24, %s2169_s23  ;;  %p2177_p2 = scmp.lt.s32.totalorder %s312_s24, %s312_s24 }
  0x29   : > { %p2178_p6 = scmp.lt.s32.totalorder %s2169_s23, %s2169_s23 }
  0x2a   : > { %p2172_p13 = pnand %p2170_p1, %p2134_p12 }
  0x2b   : > { %p2179_p5 = por %p2178_p6, %p2177_p2 }
  0x2c   : > { %p2173_p0 = pneg %p2172_p13 }
  0x2d   : > { %2026 = dma.hbm_to_vmem [thread:$0]  (!%p2516_p11), %s2853_s2, 512, %s299_s21, [#allocation8], %s2393_s28, %s2393_s28, %s2394_s29  }
  0x2e   : > { %p2180_p3 = pnand %p2179_p5, %p2173_p0 }
  0x30   : > { %2183 = shalt.err (!%p2180_p3)
}
  0x31   : > { %s2854_s3 = sld [smem:[#allocation27_spill]]  ;;  %s2195_s21 = scalar_lea.vmem %s325_s26, 512 }
  0x32   : > { %p2196_p10 = scmp.ne.s32.totalorder %s325_s26, %s2195_s21  ;;  %p2203_p9 = scmp.lt.s32.totalorder %s325_s26, %s325_s26 }
  0x33   : > { %p2204_p13 = scmp.lt.s32.totalorder %s2195_s21, %s2195_s21 }
  0x34   : > { %p2198_p7 = pnand %p2196_p10, %p2134_p12 }
  0x35   : > { %p2205_p4 = por %p2204_p13, %p2203_p9 }
  0x36   : > { %p2199_p1 = pneg %p2198_p7 }
  0x37   : > { %2029 = dma.hbm_to_vmem [thread:$0]  (!%p2516_p11), %s2854_s3, 512, %s312_s24, [#allocation11], %s2393_s28, %s2393_s28, %s2394_s29  }
  0x38   : > { %p2206_p2 = pnand %p2205_p4, %p2199_p1 }
  0x3a   : > { %2209 = shalt.err (!%p2206_p2)
}
  0x3b   : > { %s2855_s4 = sld [smem:[#allocation28_spill]]  ;;  %s54_s24 = sadd.s32 1, %s2376_s11 }
  0x3c   : > { %s45_s23 = sadd.s32 1, %s2384_s13  ;;  %p61_p4 = scmp.ne.s32.totalorder %s2376_s11, %s2372_s10 }
  0x3d   : > { %p47_p6 = scmp.ge.s32.totalorder %s45_s23, 2  ;;  %p62_p12 = scmp.eq.s32.totalorder %s2388_s14, 0 }
  0x3e   : > { %p2856_p0 = scmp.eq.s32.totalorder %s2488_s15, 1  ;;  %p2050_p3 = scmp.lt.s32.totalorder %s2388_s14, 2 }
  0x3f   : > { %s2877_s23 = smov (%p47_p6, %s45_s23), 0  ;;  %p63_p10 = por %p62_p12, %p61_p4 }
  0x40   : > { %p2553_p5 = por %p2856_p0, %p61_p4  ;;  %2858 = sst [smem:[#allocation24_spill]] %s2877_s23 }
  0x41   : > { %2032 = dma.hbm_to_vmem [thread:$0]  (!%p2516_p11), %s2855_s4, 512, %s325_s26, [#allocation11], %s2393_s28, %s2393_s28, %s2394_s29  }
  0x42   : > { %s347_s25 = sand.u32 1, %s2376_s11   ;;  %s49_s27 = ssub.s32 %s2384_s13, %s2877_s23 }
  0x43   : > { %p52_p11 = scmp.eq.s32.totalorder %s49_s27, 0  ;;  %s1846_s26 = sshll.u32 %s347_s25, 3 }
  0x44   : > { %s1847_s28 = sshll.u32 %s2384_s13, 7  ;;  %s2859_s0 = sld [smem:[#allocation25_spill]] }
  0x45   : > { %s2565_s29 = scalar_select %p52_p11, %s2376_s11, %s54_s24  }
  0x46   : > { %s351_s2 = scalar_lea.vmem [#allocation4], %s1846_s26  ;;  %p2572_p7 = pnand %p2050_p3, %p63_p10 }
  0x47   : > { %s359_s3 = sshll.u32 %s351_s2, 4  ;;  %s2579_s27 = scalar_lea.hbm %s2829_s1, %s1847_s28  ;;  %s360_s3 = int_to_ptr.vmem [resolvable:$true] %s359_s3 }
  0x48   : > { %s366_s24 = sand.u32 1, %s2388_s14   ;;  %s348_s23 = scalar_lea.sflag [#allocation5], %s347_s25 }
  0x49   : > { %p2212_p1 = pneg %p2572_p7  ;;  %s2223_s21 = scalar_lea.vmem %s360_s3, 128 }
  0x4a   : > { %s357_s20 = scalar_lea.hbm %s2859_s0, %s1847_s28  ;;  %p2224_p9 = scmp.ne.s32.totalorder %s360_s3, %s2223_s21 }
  0x4b   : > { %s2395_s2 = smov [#allocation4]  }
  0x4c   : > { %p2226_p13 = pnand %p2224_p9, %p2212_p1  ;;  %s2228_s16 = sshll.u32 %s2395_s2, 4  ;;  %s2229_s16 = int_to_ptr.vmem [resolvable:$false] %s2228_s16 }
  0x4d   : > { %s2230_s0 = scalar_lea.vmem %s2229_s16, 256  ;;  %p2231_p4 = scmp.lt.s32.totalorder %s360_s3, %s2229_s16 }
  0x4e   : > { %p2227_p2 = pneg %p2226_p13  ;;  %p2232_p6 = scmp.lt.s32.totalorder %s2230_s0, %s2223_s21 }
  0x50   : > { %p2233_p12 = por %p2232_p6, %p2231_p4 }
  0x52   : > { %p2234_p0 = pnand %p2233_p12, %p2227_p2 }
  0x54   : > { %2237 = shalt.err (!%p2234_p0)
}
  0x55   : > { %2036 = dma.hbm_to_vmem [thread:$0]  (!%p2572_p7), %s357_s20, 128, %s360_s3, %s348_s23  }
  0x56   : > { %s370_s30 = scalar_lea.vmem [#allocation7], %s1846_s26  ;;  %s367_s25 = scalar_lea.sflag [#allocation8], %s366_s24 }
  0x57   : > { %s377_s18 = sshll.u32 %s370_s30, 4  ;;  %s2396_s2 = smov [#allocation7]   ;;  %s378_s18 = int_to_ptr.vmem [resolvable:$true] %s377_s18 }
  0x58   : > { %s2251_s28 = scalar_lea.vmem %s378_s18, 128  ;;  %s2256_s16 = sshll.u32 %s2396_s2, 4  ;;  %s2257_s16 = int_to_ptr.vmem [resolvable:$false] %s2256_s16 }
  0x59   : > { %p2252_p3 = scmp.ne.s32.totalorder %s378_s18, %s2251_s28  ;;  %s2258_s0 = scalar_lea.vmem %s2257_s16, 256 }
  0x5a   : > { %p2259_p9 = scmp.lt.s32.totalorder %s378_s18, %s2257_s16  ;;  %p2260_p13 = scmp.lt.s32.totalorder %s2258_s0, %s2251_s28 }
  0x5b   : > { %p2254_p10 = pnand %p2252_p3, %p2212_p1 }
  0x5c   : > { %p2261_p2 = por %p2260_p13, %p2259_p9 }
  0x5d   : > { %p2255_p11 = pneg %p2254_p10 }
  0x5f   : > { %p2262_p4 = pnand %p2261_p2, %p2255_p11 }
  0x61   : > { %2265 = shalt.err (!%p2262_p4)
}
  0x62   : > { %2039 = dma.hbm_to_vmem [thread:$0]  (!%p2572_p7), %s2579_s27, 128, %s378_s18, %s367_s25  }
  0x63   : > { %386 = sbr.rel (%p2507_p8) target bundleno = 1366 (0x556), region = 52  ;;  %s2598_s3 = sand.u32 (!%p2507_p8), 1, %s2372_s10  }
  0x64   : > { %s2601_s23 = sshll.u32 (!%p2507_p8), %s2598_s3, 3  ;;  %s389_s26 = scalar_lea.sflag (!%p2507_p8), [#allocation5], %s2598_s3 }
  0x65   : > { %s392_s20 = scalar_lea.vmem (!%p2507_p8), [#allocation4], %s2601_s23  ;;  %p2861_p1 = scmp.ne.s32.totalorder (!%p2507_p8), %s2848_s17, 0 }
  0x68   : > { %2343 = dma.done.wait (%p2861_p1), %s389_s26, 128  }
  0x69   : > { %2345 = vsyncadd (%p2861_p1), %s389_s26, 4294967168  ;;  %s397_s4 = sand.u32 1, %s2488_s15   ;;  %s401_s27 = scalar_lea.vmem [#allocation7], %s2601_s23 }
  0x6a   : > { %s398_s19 = scalar_lea.sflag [#allocation8], %s397_s4 }
  0x6b   : > { %2347 = dma.done.wait (%p2861_p1), %s398_s19, 128  }
  0x6c   : > { %2349 = vsyncadd (%p2861_p1), %s398_s19, 4294967168  ;;  %p2862_p8 = scmp.eq.s32.totalorder %s2488_s15, 0 }
  0x6e   : > { %2351 = dma.done.wait (%p2862_p8), [#allocation8], 512   ;;  %p2863_p7 = pmov %p2862_p8 }
  0x70   : > { %2353 = vsyncadd (%p2863_p7), [#allocation8], 4294966784  ;;  %p2864_p6 = pmov %p2863_p7 }
  0x72   : > { %2355 = dma.done.wait (%p2864_p6), [#allocation11], 1024   ;;  %p2865_p12 = pmov %p2864_p6 }
  0x73   : > { %v2397_v0 = vmov 0.0   ;;  %vm2398_vm0 = vmmov 0   ;;  %v466_v1 = vld [vmem:[#allocation10 + $0x18] sm:$0xff]  ;;  %v465_v2 = vld [vmem:[#allocation10 + $0x10] sm:$0xff]  ;;  %v464_v4 = vld [vmem:[#allocation10 + $0x8] sm:$0xff]  ;;  %vm474_vm1 = vcmask 261120  }
  0x74   : > { %2357 = vsyncadd (%p2865_p12), [#allocation11], 4294966272  ;;  %1921 = vmatprep.subr.mxu0 %v2397_v0  ;;  %1929 = vmatprep.mubr.msk.f32.mxu0 %vm2398_vm0, %v2397_v0  ;;  %v583_v3 = vld [vmem:[#allocation9 + $0x18] sm:$0xff]  ;;  %v582_v5 = vld [vmem:[#allocation9 + $0x10] sm:$0xff]  ;;  %vm558_vm2 = vcmask 64512   ;;  %s2399_s30 = smov 104  }
  0x75   : > { %1932 = vmatprep.subr.mxu1 %v2397_v0  ;;  %1940 = vmatprep.mubr.msk.f32.mxu1 %vm2398_vm0, %v2397_v0  ;;  %v581_v6 = vld [vmem:[#allocation9 + $0x8] sm:$0xff]  ;;  %v463_v7 = vld [vmem:[#allocation10] sm:$0xff]  ;;  %v462_v8 = vld [vmem:[%s401_s27] sm:$0xff]  ;;  %s2400_s18 = smov 120   ;;  %s2401_s25 = smov 112  }
  0x76   : > { %1922 = vmatpush3.msra.mxu0 %v466_v1  ;;  %1933 = vmatpush3.msra.mxu1 %v583_v3  ;;  %v580_v9 = vld [vmem:[#allocation9] sm:$0xff]  ;;  %s2402_s28 = smov 96   ;;  %s1857_s2 = sshll.u32 %s2598_s3, 5 }
  0x77   : > { %1923 = vmatprep.subr.mxu0 %v2397_v0  ;;  %1934 = vmatprep.subr.mxu1 %v2397_v0  ;;  %v579_v10 = vld [vmem:[%s392_s20] sm:$0xff]  ;;  %s2709_s16 = scalar_lea.vmem [#allocation14], %s1857_s2  ;;  %s1886_s0 = sshll.u32 %s2380_s12, 9 }
  0x78   : > { %1924 = vmatpush3.msra.mxu0 %v465_v2  ;;  %1935 = vmatpush3.msra.mxu1 %v582_v5  ;;  %v1858_v11 = vld [vmem:[%s2834_s6] ss:$0 sm:$0xff]  ;;  %s1671_s26 = sshll.u32 %s2709_s16, 4  ;;  %s2752_s19 = scalar_lea.hbm %s2837_s9, %s1886_s0  ;;  %s2754_s26 = int_to_ptr.vmem [resolvable:$true] %s1671_s26 }
  0x79   : > { %1925 = vmatprep.subr.mxu0 %v2397_v0  ;;  %1936 = vmatprep.subr.mxu1 %v2397_v0  ;;  %v1860_v13 = vld [vmem:[%s2833_s5] ss:$0 sm:$0xff]  ;;  %s1643_s27 = scalar_lea.sflag [#allocation15], %s2598_s3  ;;  %s2266_s15 = scalar_lea.vmem %s2754_s26, 512 }
  0x7a   : > { %1926 = vmatpush3.msra.mxu0 %v464_v4  ;;  %1937 = vmatpush3.msra.mxu1 %v581_v6  ;;  %p2267_p0 = scmp.ne.s32.totalorder %s2754_s26, %s2266_s15  ;;  %s2403_s17 = smov [#allocation14]  }
  0x7b   : > { %1927 = vmatprep.subr.mxu0 %v2397_v0  ;;  %1938 = vmatprep.subr.mxu1 %v2397_v0  ;;  %s2270_s24 = sshll.u32 %s2403_s17, 4  ;;  %s2271_s24 = int_to_ptr.vmem [resolvable:$false] %s2270_s24 }
  0x7c   : > { %1928 = vmatpush3.msra.mxu0 %v463_v7  ;;  %1939 = vmatpush3.msra.mxu1 %v580_v9  ;;  %p2268_p3 = pnand %p2267_p0, %p2553_p5  ;;  %s2272_s21 = scalar_lea.vmem %s2271_s24, 1024 }
  0x7d   : > { %1930 = vmatmul.mubr.msk.f32.vlgmr.msra.gmra.mxu0 %vm474_vm1, %v462_v8  ;;  %1941 = vmatmul.mubr.msk.f32.vlgmr.msra.gmra.mxu1 %vm474_vm1, %v579_v10  ;;  %p2273_p11 = scmp.lt.s32.totalorder %s2754_s26, %s2271_s24  ;;  %p2274_p9 = scmp.lt.s32.totalorder %s2272_s21, %s2266_s15 }
  0x7e   : > { %1943 = vmatprep.subr.mxu0 %v2397_v0  ;;  %1945 = vmatprep.mubr.msk.f32.mxu0 %vm2398_vm0, %v2397_v0  ;;  %p2269_p10 = pneg %p2268_p3 }
  0x7f   : > { %1948 = vmatprep.subr.mxu1 %v2397_v0  ;;  %1950 = vmatprep.mubr.msk.f32.mxu1 %vm2398_vm0, %v2397_v0  ;;  %p2275_p13 = por %p2274_p9, %p2273_p11 }
  0x81   : > { %p2276_p2 = pnand %p2275_p13, %p2269_p10 }
 0x13d   : > { %v544_v12 = vpop.f32.mrf.mxu0  ;;  %v661_v15 = vpop.f32.mrf.mxu1 }
 0x13e   : > { %v2651_v14 = vadd.f32 %v1858_v11, %v544_v12  ;;  %v662_v17 = vadd.f32 %v1860_v13, %v661_v15 }
 0x13f   : > { %v1931_v16 = vpop.f32.mrf.mxu0  ;;  %v1942_v18 = vpop.f32.mrf.mxu1 }
 0x140   : > { %559 = vst.msk [vmem:[#allocation2] sm:$0xff] %vm558_vm2, %v2651_v14  ;;  %555 = vrot.lane.b32.xlu1 %v2651_v14, %s2399_s30  ;;  %549 = vrot.lane.b32.xlu0 %v2651_v14, %s2400_s18 }
 0x144   : > { %552 = vrot.lane.b32.xlu0 %v2651_v14, %s2401_s25  ;;  %666 = vrot.lane.b32.xlu1 %v662_v17, %s2400_s18 }
 0x147   : > { %v672_v19 = vld [vmem:[#allocation2] sm:$0xff] }
 0x148   : > { %1944 = vmatpush3.xpose.msk.msra.mxu0 %vm558_vm2, %v672_v19  ;;  %670 = vrot.lane.b32.xlu1 %v662_v17, %s2399_s30  ;;  %v1325_v19 = vld [vmem:[#allocation12] sm:$0xff] }
 0x149   : > { %668 = vrot.lane.b32.xlu0 %v662_v17, %s2401_s25  ;;  %1953 = vmatprep.subr.mxu0 %v2397_v0 }
 0x14b   : > { %1946 = vmatmul.mubr.msk.f32.vlgmr.msra.gmra.mxu0 %vm558_vm2, %v662_v17 }
 0x14c   : > { %1955 = vmatprep.mubr.msk.f32.mxu0 %vm2398_vm0, %v2397_v0 }
 0x1b2   : > { %v2663_v20 = vpop.permute.xlu1 %555  ;;  %v2665_v21 = vpop.permute.xlu0 %549 }
 0x1b3   : > { %562 = vst.msk [vmem:[#allocation2 + $0x18] sm:$0xff] %vm558_vm2, %v2663_v20  ;;  %560 = vst.msk [vmem:[#allocation2 + $0x8] sm:$0xff] %vm558_vm2, %v2665_v21 }
 0x1b6   : > { %v2671_v22 = vpop.permute.xlu0 %552  ;;  %v667_v23 = vpop.permute.xlu1 %666 }
 0x1b7   : > { %561 = vst.msk [vmem:[#allocation2 + $0x10] sm:$0xff] %vm558_vm2, %v2671_v22 }
 0x1ba   : > { %v673_v24 = vld [vmem:[#allocation2 + $0x8] sm:$0xff]  ;;  %v675_v26 = vld [vmem:[#allocation2 + $0x18] sm:$0xff]  ;;  %v671_v27 = vpop.permute.xlu1 %670 }
 0x1bb   : > { %1949 = vmatpush3.xpose.msk.msra.mxu1 %vm558_vm2, %v673_v24  ;;  %v669_v28 = vpop.permute.xlu0 %668  ;;  %v1327_v24 = vld [vmem:[#allocation12 + $0x10] sm:$0xff] }
 0x1bc   : > { %1958 = vmatprep.subr.mxu1 %v2397_v0 }
 0x1be   : > { %1951 = vmatmul.mubr.msk.f32.vlgmr.msra.gmra.mxu1 %vm558_vm2, %v667_v23  ;;  %v674_v25 = vld [vmem:[#allocation2 + $0x10] sm:$0xff]  ;;  %v1326_v23 = vld [vmem:[#allocation12 + $0x8] sm:$0xff] }
 0x1bf   : > { %1954 = vmatpush3.xpose.msk.msra.mxu0 %vm558_vm2, %v674_v25  ;;  %1959 = vmatpush3.xpose.msk.msra.mxu1 %vm558_vm2, %v675_v26 }
 0x1c0   : > { %1960 = vmatprep.mubr.msk.f32.mxu1 %vm2398_vm0, %v2397_v0  ;;  %1963 = vmatprep.subr.mxu0 %v2397_v0 }
 0x1c1   : > { %1968 = vmatprep.subr.mxu1 %v2397_v0 }
 0x1c2   : > { %1956 = vmatmul.mubr.msk.f32.vlgmr.msra.gmra.mxu0 %vm558_vm2, %v669_v28  ;;  %1961 = vmatmul.mubr.msk.f32.vlgmr.msra.gmra.mxu1 %vm558_vm2, %v671_v27  ;;  %v1328_v28 = vld [vmem:[#allocation12 + $0x18] sm:$0xff] }
 0x1c3   : > { %1965 = vmatprep.mubr.msk.f32.mxu0 %vm2398_vm0, %v2397_v0  ;;  %1970 = vmatprep.mubr.msk.f32.mxu1 %vm2398_vm0, %v2397_v0 }
 0x20b   : > { %v748_v29 = vpop.f32.mrf.mxu0 }
 0x20c   : > { %v977_v30 = vmul.f32 0.35355338, %v748_v29 }
 0x20d   : > { %v1947_v31 = vpop.f32.mrf.mxu0 }
 0x20e   : > { %v981_v32 = vsel %vm558_vm2, %v977_v30, -inf }
 0x20f   : > { %982 = vmax.xlane.f32.xlu0 %v981_v32 }
 0x27e   : > { %v823_v33 = vpop.f32.mrf.mxu1 }
 0x27f   : > { %v978_v34 = vmul.f32 0.35355338, %v823_v33 }
 0x280   : > { %v1952_v35 = vpop.f32.mrf.mxu1 }
 0x281   : > { %v984_v36 = vsel %vm558_vm2, %v978_v34, -inf }
 0x282   : > { %985 = vmax.xlane.f32.xlu1 %v984_v36  ;;  %v898_v37 = vpop.f32.mrf.mxu0  ;;  %v973_v38 = vpop.f32.mrf.mxu1 }
 0x283   : > { %v979_v39 = vmul.f32 0.35355338, %v898_v37  ;;  %v980_v42 = vmul.f32 0.35355338, %v973_v38 }
 0x284   : > { %v1957_v40 = vpop.f32.mrf.mxu0  ;;  %v1962_v41 = vpop.f32.mrf.mxu1 }
 0x285   : > { %v987_v43 = vsel %vm558_vm2, %v979_v39, -inf  ;;  %v990_v44 = vsel %vm558_vm2, %v980_v42, -inf }
 0x286   : > { %988 = vmax.xlane.f32.xlu0 %v987_v43 }
 0x28a   : > { %991 = vmax.xlane.f32.xlu0 %v990_v44 }
 0x293   : > { %563 = vrot.lane.b32.xlu1 %v2651_v14, %s2402_s28 }
 0x298   : > { %v983_v45 = vpop.xlane.xlu0 %982 }
 0x299   : > { %v993_v46 = vsub.f32 %v977_v30, %v983_v45 }
 0x29b   : > { %v997_v47 = vmul.f32 1.442695, %v993_v46 }
 0x29d   : > { %2116 = vpow2.f32 %v997_v47 }
 0x2aa   : > { %v2117_v48 = vpop.eup %2116 }
 0x2ab   : > { %v1005_v49 = vsel %vm558_vm2, %v2117_v48, 0.0 }
 0x2b7   : > { %1006 = vadd.xlane.f32.xlu1 %v1005_v49 }
 0x30b   : > { %v986_v50 = vpop.xlane.xlu1 %985 }
 0x30c   : > { %v994_v51 = vsub.f32 %v978_v34, %v986_v50 }
 0x30e   : > { %v999_v52 = vmul.f32 1.442695, %v994_v51 }
 0x30f   : > { %v564_v53 = vpop.permute.xlu1 %563  ;;  %v989_v54 = vpop.xlane.xlu0 %988 }
 0x310   : > { %2118 = vpow2.f32 %v999_v52  ;;  %575 = vst.msk [vmem:[#allocation3] sm:$0xff] %vm558_vm2, %v564_v53  ;;  %v995_v55 = vsub.f32 %v979_v39, %v989_v54 }
 0x312   : > { %v1001_v56 = vmul.f32 1.442695, %v995_v55 }
 0x313   : > { %v992_v57 = vpop.xlane.xlu0 %991 }
 0x314   : > { %2120 = vpow2.f32 %v1001_v56  ;;  %v996_v58 = vsub.f32 %v980_v42, %v992_v57 }
 0x316   : > { %v1003_v59 = vmul.f32 1.442695, %v996_v58 }
 0x317   : > { %v1029_v60 = vld [vmem:[#allocation3] sm:$0xff] }
 0x318   : > { %2122 = vpow2.f32 %v1003_v59  ;;  %1964 = vmatpush3.msra.mxu0 %v1029_v60 }
 0x319   : > { %1973 = vmatprep.subr.mxu0 %v2397_v0 }
 0x31d   : > { %v2119_v61 = vpop.eup %2118 }
 0x31e   : > { %v1008_v62 = vsel %vm558_vm2, %v2119_v61, 0.0 }
 0x31f   : > { %1009 = vadd.xlane.f32.xlu0 %v1008_v62 }
 0x321   : > { %v2121_v63 = vpop.eup %2120 }
 0x322   : > { %v1011_v1 = vsel %vm558_vm2, %v2121_v63, 0.0 }
 0x323   : > { %1012 = vadd.xlane.f32.xlu1 %v1011_v1 }
 0x325   : > { %v2123_v2 = vpop.eup %2122 }
 0x326   : > { %v1014_v3 = vsel %vm558_vm2, %v2123_v2, 0.0 }
 0x327   : > { %1015 = vadd.xlane.f32.xlu0 %v1014_v3 }
 0x334   : > { %567 = vrot.lane.b32.xlu1 %v2671_v22, %s2402_s28 }
 0x338   : > { %569 = vrot.lane.b32.xlu1 %v2663_v20, %s2402_s28 }
 0x33d   : > { %565 = vrot.lane.b32.xlu0 %v2665_v21, %s2402_s28 }
 0x340   : > { %v1007_v4 = vpop.xlane.xlu1 %1006 }
 0x341   : > { %2124 = vrcp.f32 %v1007_v4 }
 0x34e   : > { %v2125_v5 = vpop.eup %2124 }
 0x34f   : > { %v1021_v6 = vmul.f32 %v2125_v5, %v2117_v48 }
 0x351   : > { %1025 = vst.msk [vmem:[%s2709_s16] sm:$0xff] %vm558_vm2, %v1021_v6  ;;  %1966 = vmatmul.mubr.msk.f32.vlgmr.msra.gmra.mxu0 %vm558_vm2, %v1021_v6 }
 0x352   : > { %1975 = vmatprep.mubr.msk.f32.mxu0 %vm2398_vm0, %v2397_v0 }
 0x3a8   : > { %v1010_v7 = vpop.xlane.xlu0 %1009 }
 0x3a9   : > { %2126 = vrcp.f32 %v1010_v7 }
 0x3ac   : > { %v1013_v8 = vpop.xlane.xlu1 %1012 }
 0x3ad   : > { %2128 = vrcp.f32 %v1013_v8 }
 0x3b0   : > { %v568_v9 = vpop.permute.xlu1 %567  ;;  %v1016_v10 = vpop.xlane.xlu0 %1015 }
 0x3b1   : > { %577 = vst.msk [vmem:[#allocation3 + $0x10] sm:$0xff] %vm558_vm2, %v568_v9  ;;  %2130 = vrcp.f32 %v1016_v10 }
 0x3b4   : > { %v570_v11 = vpop.permute.xlu1 %569  ;;  %v566_v12 = vpop.permute.xlu0 %565 }
 0x3b5   : > { %578 = vst.msk [vmem:[#allocation3 + $0x18] sm:$0xff] %vm558_vm2, %v570_v11  ;;  %576 = vst.msk [vmem:[#allocation3 + $0x8] sm:$0xff] %vm558_vm2, %v566_v12 }
 0x3b6   : > { %v2127_v13 = vpop.eup %2126 }
 0x3b7   : > { %v1022_v14 = vmul.f32 %v2127_v13, %v2119_v61 }
 0x3b8   : > { %v1031_v15 = vld [vmem:[#allocation3 + $0x10] sm:$0xff] }
 0x3b9   : > { %1974 = vmatpush3.msra.mxu0 %v1031_v15  ;;  %1026 = vst.msk [vmem:[%s2709_s16 + $0x8] sm:$0xff] %vm558_vm2, %v1022_v14 }
 0x3ba   : > { %v2129_v16 = vpop.eup %2128  ;;  %1983 = vmatprep.subr.mxu0 %v2397_v0 }
 0x3bb   : > { %v1023_v17 = vmul.f32 %v2129_v16, %v2121_v63 }
 0x3bc   : > { %v1030_v18 = vld [vmem:[#allocation3 + $0x8] sm:$0xff]  ;;  %v1032_v21 = vld [vmem:[#allocation3 + $0x18] sm:$0xff] }
 0x3bd   : > { %1969 = vmatpush3.msra.mxu1 %v1030_v18  ;;  %1027 = vst.msk [vmem:[%s2709_s16 + $0x10] sm:$0xff] %vm558_vm2, %v1023_v17  ;;  %1976 = vmatmul.mubr.msk.f32.vlgmr.msra.gmra.mxu0 %vm558_vm2, %v1023_v17 }
 0x3be   : > { %v2131_v20 = vpop.eup %2130  ;;  %1971 = vmatmul.mubr.msk.f32.vlgmr.msra.gmra.mxu1 %vm558_vm2, %v1022_v14  ;;  %1978 = vmatprep.subr.mxu1 %v2397_v0 }
 0x3bf   : > { %1979 = vmatpush3.msra.mxu1 %v1032_v21  ;;  %1980 = vmatprep.mubr.msk.f32.mxu1 %vm2398_vm0, %v2397_v0  ;;  %v1024_v22 = vmul.f32 %v2131_v20, %v2123_v2 }
 0x3c0   : > { %1984 = vmatpush3.msra.mxu0 %v1325_v19  ;;  %1985 = vmatprep.mubr.msk.f32.mxu0 %vm2398_vm0, %v2397_v0 }
 0x3c1   : > { %1028 = vst.msk [vmem:[%s2709_s16 + $0x18] sm:$0xff] %vm558_vm2, %v1024_v22  ;;  %1993 = vmatprep.subr.mxu0 %v2397_v0  ;;  %1988 = vmatprep.subr.mxu1 %v2397_v0 }
 0x3c2   : > { %1981 = vmatmul.mubr.msk.f32.vlgmr.msra.gmra.mxu1 %vm558_vm2, %v1024_v22 }
 0x3c3   : > { %1990 = vmatprep.mubr.msk.f32.mxu1 %vm2398_vm0, %v2397_v0  ;;  %1989 = vmatpush3.msra.mxu1 %v1326_v23 }
 0x3c4   : > { %1998 = vmatprep.subr.mxu1 %v2397_v0 }
 0x411   : > { %v1102_v25 = vpop.f32.mrf.mxu0 }
 0x412   : > { %1986 = vmatmul.mubr.msk.f32.vlgmr.msra.gmra.mxu0 %vm558_vm2, %v1102_v25 }
 0x413   : > { %v1967_v26 = vpop.f32.mrf.mxu0  ;;  %1994 = vmatpush3.msra.mxu0 %v1327_v24  ;;  %1995 = vmatprep.mubr.msk.f32.mxu0 %vm2398_vm0, %v2397_v0 }
 0x47d   : > { %v1248_v27 = vpop.f32.mrf.mxu0 }
 0x47e   : > { %v1175_v29 = vpop.f32.mrf.mxu1  ;;  %1996 = vmatmul.mubr.msk.f32.vlgmr.msra.gmra.mxu0 %vm558_vm2, %v1248_v27 }
 0x47f   : > { %v1977_v30 = vpop.f32.mrf.mxu0  ;;  %1991 = vmatmul.mubr.msk.f32.vlgmr.msra.gmra.mxu1 %vm558_vm2, %v1175_v29 }
 0x480   : > { %v1972_v31 = vpop.f32.mrf.mxu1  ;;  %1999 = vmatpush3.msra.mxu1 %v1328_v28  ;;  %2000 = vmatprep.mubr.msk.f32.mxu1 %vm2398_vm0, %v2397_v0 }
 0x482   : > { %v1321_v32 = vpop.f32.mrf.mxu1 }
 0x483   : > { %2001 = vmatmul.mubr.msk.f32.vlgmr.msra.gmra.mxu1 %vm558_vm2, %v1321_v32 }
 0x484   : > { %v1982_v33 = vpop.f32.mrf.mxu1 }
 0x485   : > { %2279 = shalt.err (!%p2276_p2)
}
 0x486   : > { %s2280_s30 = scalar_lea.hbm %s2752_s19, 512  ;;  %s2284_s28 = scalar_lea.hbm %s2837_s9, 1024 }
 0x487   : > { %p2281_p4 = scmp.ne.s32.totalorder %s2752_s19, %s2280_s30  ;;  %p2285_p7 = scmp.lt.s32.totalorder %s2752_s19, %s2837_s9 }
 0x488   : > { %p2286_p6 = scmp.lt.s32.totalorder %s2284_s28, %s2280_s30 }
 0x489   : > { %p2282_p1 = pnand %p2281_p4, %p2553_p5 }
 0x48a   : > { %p2287_p12 = por %p2286_p6, %p2285_p7 }
 0x48b   : > { %p2283_p8 = pneg %p2282_p1 }
 0x48d   : > { %p2288_p0 = pnand %p2287_p12, %p2283_p8 }
 0x48f   : > { %2291 = shalt.err (!%p2288_p0)
}
 0x490   : > { %s2404_s0 = smov 128   ;;  %s2405_s20 = smov 8   ;;  %v1878_v46 = vld [vmem:[%s2835_s7] ss:$0 sm:$0xff] }
 0x491   : > { %2020 = dma.vmem_to_hbm [thread:$0]  (%p2553_p5), %s2754_s26, 512, %s2752_s19, %s1643_s27, %s2404_s0, %s2404_s0, %s2405_s20  }
 0x492   : > { %s1881_s19 = sshll.u32 %s2380_s12, 7  ;;  %s450_s27 = scalar_lea.vmem [#allocation13], %s2601_s23 }
 0x493   : > { %s1657_s15 = sshll.u32 %s450_s27, 4  ;;  %s1655_s21 = scalar_lea.hbm %s2836_s8, %s1881_s19  ;;  %s1658_s15 = int_to_ptr.vmem [resolvable:$true] %s1657_s15 }
 0x494   : > { %s1638_s30 = scalar_lea.sflag [#allocation6], %s2598_s3  ;;  %s2292_s18 = scalar_lea.vmem %s1658_s15, 128 }
 0x495   : > { %p2293_p3 = scmp.ne.s32.totalorder %s1658_s15, %s2292_s18  ;;  %s2406_s25 = smov [#allocation13]  }
 0x496   : > { %s2296_s12 = sshll.u32 %s2406_s25, 4  ;;  %s2297_s12 = int_to_ptr.vmem [resolvable:$false] %s2296_s12 }
 0x497   : > { %p2294_p10 = pnand %p2293_p3, %p2553_p5  ;;  %s2298_s23 = scalar_lea.vmem %s2297_s12, 256 }
 0x498   : > { %p2299_p9 = scmp.lt.s32.totalorder %s1658_s15, %s2297_s12  ;;  %p2300_p13 = scmp.lt.s32.totalorder %s2298_s23, %s2292_s18 }
 0x499   : > { %p2295_p11 = pneg %p2294_p10 }
 0x49a   : > { %p2301_p2 = por %p2300_p13, %p2299_p9 }
 0x49c   : > { %p2302_p4 = pnand %p2301_p2, %p2295_p11 }
 0x4d2   : > { %v1398_v0 = vpop.f32.mrf.mxu0 }
 0x4d3   : > { %v1621_v37 = vsel %vm474_vm1, %v1398_v0, 0.0 }
 0x4d4   : > { %v1987_v34 = vpop.f32.mrf.mxu0 }
 0x53e   : > { %v1544_v35 = vpop.f32.mrf.mxu0 }
 0x53f   : > { %v1471_v36 = vpop.f32.mrf.mxu1  ;;  %v1624_v42 = vsel %vm474_vm1, %v1544_v35, 0.0 }
 0x540   : > { %v1622_v38 = vsel %vm474_vm1, %v1471_v36, 0.0  ;;  %v1997_v39 = vpop.f32.mrf.mxu0 }
 0x541   : > { %v1623_v40 = vadd.f32 %v1622_v38, %v1621_v37  ;;  %v1992_v41 = vpop.f32.mrf.mxu1 }
 0x543   : > { %v1617_v43 = vpop.f32.mrf.mxu1  ;;  %v1625_v44 = vadd.f32 %v1624_v42, %v1623_v40 }
 0x544   : > { %v1626_v45 = vsel %vm474_vm1, %v1617_v43, 0.0 }
 0x545   : > { %v1627_v47 = vadd.f32 %v1626_v45, %v1625_v44  ;;  %v2002_v48 = vpop.f32.mrf.mxu1 }
 0x547   : > { %v1635_v49 = vadd.f32 %v1878_v46, %v1627_v47 }
 0x549   : > { %1636 = vst.msk [vmem:[%s450_s27] sm:$0xff] %vm474_vm1, %v1635_v49 }
 0x54a   : > { %2305 = shalt.err (!%p2302_p4)
}
 0x54b   : > { %s2306_s28 = scalar_lea.hbm %s1655_s21, 128  ;;  %s2310_s16 = scalar_lea.hbm %s2836_s8, 256 }
 0x54c   : > { %p2307_p1 = scmp.ne.s32.totalorder %s1655_s21, %s2306_s28  ;;  %p2311_p6 = scmp.lt.s32.totalorder %s1655_s21, %s2836_s8 }
 0x54d   : > { %p2312_p12 = scmp.lt.s32.totalorder %s2310_s16, %s2306_s28 }
 0x54e   : > { %p2308_p8 = pnand %p2307_p1, %p2553_p5 }
 0x54f   : > { %p2313_p0 = por %p2312_p12, %p2311_p6 }
 0x550   : > { %p2309_p7 = pneg %p2308_p8 }
 0x552   : > { %p2314_p3 = pnand %p2313_p0, %p2309_p7 }
 0x554   : > { %2317 = shalt.err (!%p2314_p3)
}
 0x555   : > { %2019 = dma.vmem_to_hbm [thread:$0]  (%p2553_p5), %s1658_s15, 128, %s1655_s21, %s1638_s30  }
 0x556 PF: > { %s2866_s26 = sld [smem:[#allocation22_spill]]  ;;  %p2869_p11 = scmp.ge.s32.totalorder %s2388_s14, 2 }
 0x557   : > { %s2867_s4 = sld [smem:[#allocation23_spill]] }
 0x55c   : > { %s1686_s19 = sand.u32 1, %s2866_s26  }
 0x55d   : > { %p2868_p10 = scmp.ne.s32.totalorder %s2867_s4, 0  ;;  %s1687_s27 = scalar_lea.sflag [#allocation6], %s1686_s19 }
 0x55f   : > { %p2041_p9 = pnand %p2869_p11, %p2868_p10 }
 0x561   : > { %p2042_p13 = pneg %p2041_p9 }
 0x563   : > { %2359 = dma.done.wait (%p2042_p13), %s1687_s27, 128  }
 0x564   : > { %2361 = vsyncadd (%p2042_p13), %s1687_s27, 4294967168  ;;  %s1696_s17 = scalar_lea.sflag [#allocation15], %s1686_s19 }
 0x565   : > { %2363 = dma.done.wait (%p2042_p13), %s1696_s17, 512  }
 0x566   : > { %2365 = vsyncadd (%p2042_p13), %s1696_s17, 4294966784  ;;  %s33_s14 = sadd.s32 1, %s2388_s14   ;;  %s2870_s22 = sld [smem:[#allocation24_spill]] }
 0x567   : > { %p30_p2 = scmp.ge.s32.totalorder %s33_s14, 4   ;;  %s2871_s30 = smov %s2372_s10 }
 0x568   : > { %s2872_s10 = smov %s2376_s11  ;;  %s2873_s11 = smov %s2565_s29 }
 0x569   : > { %s2874_s12 = smov %s2384_s13  ;;  %32 = sbr.rel (!%p30_p2) target bundleno = 16 (0x10), region = 143 }
 0x56c   : > { %s2875_s13 = smov %s2870_s22 }
 0x56e   :  { %1701 = vsyncpa [#allocation5], 1 }
 0x56f   :  { %1703 = vsyncpa [#allocation5 + $0x1], 1 }
 0x570   :  { %1704 = vsyncpa [#allocation8], 1 }
 0x571   :  { %1706 = vsyncpa [#allocation8 + $0x1], 1 }
 0x572   :  { %1707 = vsyncpa [#allocation11], 1 }
 0x573   :  { %1708 = vsyncpa [#allocation6], 1 }
 0x574   :  { %1710 = vsyncpa [#allocation6 + $0x1], 1 }
 0x575   :  { %1711 = vsyncpa [#allocation15], 1 }
 0x576   :  { %1713 = vsyncpa [#allocation15 + $0x1], 1 }

</bundles_post_ra>
